<compile_context>
chip_gen: v6e
topology: v6e:2x2x1
jax: 0.10.0
libtpu: 0.0.40
codegen_flags: <defaults>
</compile_context>

<pallas_src>
import math

import jax
import jax.numpy as jnp
from jax import lax
from jax.experimental import pallas as pl
from jax.experimental.pallas import tpu as pltpu

_INV_SQRT2 = 0.7071067811865476
_SQRT_2_OVER_PI = 0.7978845608028654


def _round_up(n, m):
    return (n + m - 1) // m * m


def _cdiv(a, b):
    return (a + b - 1) // b


def _vmem_capacity_bytes():
    try:
        return int(pltpu.get_tpu_info().vmem_capacity_bytes)
    except Exception:
        return 128 << 20  # conservative fallback (v5e/v6e physical)


def _pick_tm(n, tm_max):
    """Row-tile size: multiple of 8, last tile nearly full, >=2 tiles when possible."""
    n8 = _round_up(max(n, 1), 8)
    if n8 <= 8:
        return 8, 1
    n_tiles = max(_cdiv(n8, tm_max), 2)          # >=2 row tiles -> v7x second core usable
    tm = _round_up(_cdiv(n8, n_tiles), 8)        # right-sized: minimal dead-row padding
    return tm, n_tiles


def _pick_th(h_pad, th_max=512):
    """Hidden-dim tile: keep small H un-tiled; stream big H in MXU-friendly chunks."""
    if h_pad <= th_max:
        return h_pad
    for cand in (512, 256, 128):                 # 256-multiples preferred on v6e/v7x MXU
        if cand <= th_max and h_pad % cand == 0:
            return cand
    return 128                                   # h_pad is always a multiple of 128


def _pad2(a, shape, dtype):
    a = jnp.asarray(a, dtype)
    if a.shape == shape:
        return a
    return jnp.zeros(shape, dtype).at[: a.shape[0], : a.shape[1]].set(a)


def _make_kernel(c_real, use_bf16, approx_gelu):
    inv_c = 1.0 / float(c_real)
    mm_dtype = jnp.bfloat16 if use_bf16 else jnp.float32

    def kernel(x_ref, g_ref, b_ref, w1_ref, b1_ref, w2_ref, b2_ref, o_ref,
               xn_ref, acc_ref):
        j = pl.program_id(1)

        # ---- LayerNorm (eps=1e-6) once per row tile; result cached in VMEM ----
        @pl.when(j == 0)
        def _():
            x = x_ref[...].astype(jnp.float32)
            mean = jnp.sum(x, axis=-1, keepdims=True) * inv_c
            # Padded lanes of x are zero, so sum(x*x) is exact over the real C:
            # no iota/where masking pass needed.
            var = jnp.maximum(
                jnp.sum(x * x, axis=-1, keepdims=True) * inv_c - mean * mean, 0.0)
            xn = (x - mean) * lax.rsqrt(var + 1e-6)
            # gamma/beta are zero in padded lanes -> xn stays 0 there.
            xn = xn * g_ref[...].astype(jnp.float32) + b_ref[...].astype(jnp.float32)
            xn_ref[...] = xn.astype(mm_dtype)
            acc_ref[...] = jnp.zeros_like(acc_ref)

        # ---- fc1 block + GELU (per hidden-dim block) ----
        h = jnp.dot(xn_ref[...], w1_ref[...], preferred_element_type=jnp.float32)
        h = h + b1_ref[...].astype(jnp.float32)
        if approx_gelu:
            # tanh approximation -> EUP slot instead of the long erf VPU polynomial.
            h = 0.5 * h * (1.0 + jnp.tanh(_SQRT_2_OVER_PI * (h + 0.044715 * h * h * h)))
        else:
            # Exact erf GELU matches PyTorch nn.GELU(approximate='none').
            h = 0.5 * h * (1.0 + lax.erf(h * _INV_SQRT2))

        # ---- fc2 block, accumulated over hidden-dim blocks ----
        acc_ref[...] += jnp.dot(h.astype(mm_dtype), w2_ref[...],
                                preferred_element_type=jnp.float32)

        # ---- finalize: bias + residual (re-read x_ref: short live range) ----
        @pl.when(j == pl.num_programs(1) - 1)
        def _():
            y = acc_ref[...] + b2_ref[...].astype(jnp.float32)
            o_ref[...] = (x_ref[...].astype(jnp.float32) + y).astype(o_ref.dtype)

    return kernel


def resmlp_forward(x, params, *, tm_max=None, use_bf16=True, approx_gelu=False):
    """x: (N, C) float32. params: gamma/beta/w1/b1/w2/b2 with PyTorch ResMLP semantics."""
    N, C = x.shape
    H = params["w1"].shape[1]

    C_pad = _round_up(C, 128)
    H_pad = _round_up(H, 128)

    vmem_cap = _vmem_capacity_bytes()
    if tm_max is None:
        # 128-MiB-VMEM chips (v5e/v6e) can afford bigger row tiles; v7x (64 MiB/TC) stays at 256.
        tm_max = 512 if vmem_cap >= (100 << 20) else 256

    tm, n_row = _pick_tm(N, tm_max)
    N_pad = tm * n_row
    tH = _pick_th(H_pad)
    n_h = H_pad // tH

    w_dtype = jnp.bfloat16 if use_bf16 else jnp.float32
    wsize = 2 if use_bf16 else 4

    # Zero padding keeps padded lanes identically zero through LN->fc1->GELU->fc2->+x.
    # Skipped entirely when shapes are already lane/row aligned (no extra HBM round-trip).
    xp = _pad2(x.astype(jnp.float32), (N_pad, C_pad), jnp.float32)
    gamma = _pad2(jnp.reshape(params["gamma"], (1, C)), (1, C_pad), jnp.float32)
    beta = _pad2(jnp.reshape(params["beta"], (1, C)), (1, C_pad), jnp.float32)
    w1 = _pad2(params["w1"], (C_pad, H_pad), w_dtype)
    b1 = _pad2(jnp.reshape(params["b1"], (1, H)), (1, H_pad), jnp.float32)
    w2 = _pad2(params["w2"], (H_pad, C_pad), w_dtype)
    b2 = _pad2(jnp.reshape(params["b2"], (1, C)), (1, C_pad), jnp.float32)

    def resident(shape):
        # Constant-index resident parameter; single-buffered (no pointless double buffer).
        return pl.BlockSpec(shape, lambda i, j: (0, 0), pipeline_mode=pl.Buffered(1))

    # Generation-aware scoped-VMEM budget; never below the computed working set.
    working = (
        2 * 2 * C_pad * tH * wsize     # w1 + w2 streamed blocks (double-buffered)
        + 2 * tH * 4                   # b1 blocks
        + 3 * C_pad * 4                # gamma, beta, b2 (resident)
        + 2 * tm * C_pad * 4           # x row tiles (double-buffered)
        + 2 * tm * C_pad * 4           # out row tiles (double-buffered)
        + tm * C_pad * (wsize + 4)     # xn + acc scratch
        + 2 * tm * tH * 4              # hidden activation headroom
    )
    vmem_limit = max(int(1.5 * working), 32 << 20)
    vmem_limit = min(vmem_limit, int(0.9 * vmem_cap))
    vmem_limit = int(max(vmem_limit, working + (1 << 20)))

    out = pl.pallas_call(
        _make_kernel(C, use_bf16, approx_gelu),
        out_shape=jax.ShapeDtypeStruct((N_pad, C_pad), x.dtype),
        grid_spec=pltpu.PrefetchScalarGridSpec(
            num_scalar_prefetch=0,
            grid=(n_row, n_h),                                 # rows parallel, H reduction last
            in_specs=[
                pl.BlockSpec((tm, C_pad), lambda i, j: (i, 0)),   # x row tile (resident over j)
                resident((1, C_pad)),                             # gamma
                resident((1, C_pad)),                             # beta
                pl.BlockSpec((C_pad, tH), lambda i, j: (0, j)),   # fc1 weight block (streamed)
                pl.BlockSpec((1, tH), lambda i, j: (0, j)),       # fc1 bias block
                pl.BlockSpec((tH, C_pad), lambda i, j: (j, 0)),   # fc2 weight block (streamed)
                resident((1, C_pad)),                             # fc2 bias
            ],
            out_specs=pl.BlockSpec((tm, C_pad), lambda i, j: (i, 0)),
            scratch_shapes=[
                pltpu.VMEM((tm, C_pad), w_dtype),      # cached LayerNorm output
                pltpu.VMEM((tm, C_pad), jnp.float32),  # fc2 accumulator
            ],
        ),
        compiler_params=pltpu.CompilerParams(
            dimension_semantics=("parallel", "arbitrary"),
            vmem_limit_bytes=vmem_limit,
        ),
    )(xp, gamma, beta, w1, b1, w2, b2)

    if (N_pad, C_pad) != (N, C):
        out = out[:N, :C]
    return out


def init_params(key, indim, hidden):
    # Deterministic synthetic init (uniform like PyTorch Linear default bounds).
    k1, k2, k3, k4 = jax.random.split(key, 4)
    lim1 = 1.0 / math.sqrt(indim)
    lim2 = 1.0 / math.sqrt(hidden)
    return {
        "gamma": jnp.ones((1, indim), jnp.float32),
        "beta": jnp.zeros((1, indim), jnp.float32),
        # stored as (in, out) so the kernel does x @ W directly
        "w1": jax.random.uniform(k1, (indim, hidden), jnp.float32, -lim1, lim1),
        "b1": jax.random.uniform(k2, (1, hidden), jnp.float32, -lim1, lim1),
        "w2": jax.random.uniform(k3, (hidden, indim), jnp.float32, -lim2, lim2),
        "b2": jax.random.uniform(k4, (1, indim), jnp.float32, -lim2, lim2),
    }


def resmlp_reference(x, p):
    mean = jnp.mean(x, axis=-1, keepdims=True)
    var = jnp.mean(jnp.square(x - mean), axis=-1, keepdims=True)
    xn = (x - mean) / jnp.sqrt(var + 1e-6) * p["gamma"] + p["beta"]
    h = xn @ p["w1"] + p["b1"]
    h = 0.5 * h * (1.0 + lax.erf(h * _INV_SQRT2))
    return x + (h @ p["w2"] + p["b2"])


if __name__ == "__main__":
    key = jax.random.PRNGKey(0)
    kx, kp = jax.random.split(key)

    # Small shape consistent with the module: (B, S, indim) tokens through ResMLP.
    B, S, indim, hidden = 2, 8, 32, 64
    x = jax.random.normal(kx, (B, S, indim), jnp.float32)
    params = init_params(kp, indim, hidden)

    x2d = x.reshape(B * S, indim)           # glue reshape in plain JAX
    ref = resmlp_reference(x2d, params)

    # Strict check of the kernel math (f32 matmuls, exact-erf GELU).
    # TODO(synk): at much larger C/H a HIGHEST-precision f32 matmul may be needed for 1e-4.
    out_f32 = jax.block_until_ready(resmlp_forward(x2d, params, use_bf16=False))
    assert jnp.allclose(out_f32, ref, atol=1e-4, rtol=1e-4), "f32 kernel mismatch"

    # Performance path: bf16 MXU operands, f32 accumulation / elementwise.
    out_bf16 = jax.block_until_ready(resmlp_forward(x2d, params, use_bf16=True))
    assert jnp.allclose(out_bf16, ref, atol=2e-2, rtol=2e-2), "bf16 kernel mismatch"

    # Optional tanh-GELU fast path (EUP) — slightly different numerics than PyTorch exact GELU.
    out_tanh = jax.block_until_ready(
        resmlp_forward(x2d, params, use_bf16=True, approx_gelu=True))
    assert jnp.allclose(out_tanh, ref, atol=3e-2, rtol=3e-2), "tanh-gelu kernel mismatch"

    # Second shape exercising H-streaming (2 hidden blocks) + right-sized row tiles.
    N2, C2, H2 = 300, 128, 1024
    k1, k2 = jax.random.split(kx)
    x2 = jax.random.normal(k1, (N2, C2), jnp.float32)
    p2 = init_params(k2, C2, H2)
    ref2 = resmlp_reference(x2, p2)
    out2 = jax.block_until_ready(resmlp_forward(x2, p2, use_bf16=True))
    assert jnp.allclose(out2, ref2, atol=2e-2, rtol=2e-2), "tiled-H kernel mismatch"

    _ = out_bf16.reshape(B, S, indim)
    print("KERNEL_OK")
</pallas_src>

<mosaic_0001>
module attributes {stable_mosaic.version = 11 : i64} {
  func.func @kernel(%arg0: i32, %arg1: i32, %arg2: memref<8x128xf32, #tpu.memory_space<vmem>>, %arg3: memref<1x128xf32, #tpu.memory_space<vmem>>, %arg4: memref<1x128xf32, #tpu.memory_space<vmem>>, %arg5: memref<128x128xf32, #tpu.memory_space<vmem>>, %arg6: memref<1x128xf32, #tpu.memory_space<vmem>>, %arg7: memref<128x128xf32, #tpu.memory_space<vmem>>, %arg8: memref<1x128xf32, #tpu.memory_space<vmem>>, %arg9: memref<8x128xf32, #tpu.memory_space<vmem>>, %arg10: memref<8x128xf32, #tpu.memory_space<vmem>>, %arg11: memref<8x128xf32, #tpu.memory_space<vmem>>) attributes {dimension_semantics = [#tpu.dimension_semantics<parallel>, #tpu.dimension_semantics<arbitrary>], iteration_bounds = array<i64: 2, 1>, scalar_prefetch = 0 : i64, scratch_operands = 2 : i64, tpu.core_type = #tpu.core_type<tc>, window_params = [{transform_indices = @transform_0, window_bounds = array<i64: 8, 128>}, {pipeline_mode = #tpu.pipeline_mode<synchronous>, transform_indices = @transform_1, window_bounds = array<i64: 1, 128>}, {pipeline_mode = #tpu.pipeline_mode<synchronous>, transform_indices = @transform_2, window_bounds = array<i64: 1, 128>}, {transform_indices = @transform_3, window_bounds = array<i64: 128, 128>}, {transform_indices = @transform_4, window_bounds = array<i64: 1, 128>}, {transform_indices = @transform_5, window_bounds = array<i64: 128, 128>}, {pipeline_mode = #tpu.pipeline_mode<synchronous>, transform_indices = @transform_6, window_bounds = array<i64: 1, 128>}, {transform_indices = @transform_7, window_bounds = array<i64: 8, 128>}]} {
    %c0_i32 = arith.constant 0 : i32
    %0 = arith.cmpi eq, %arg1, %c0_i32 : i32
    %1 = arith.extui %0 : i1 to i32
    %c0_i32_0 = arith.constant 0 : i32
    %2 = arith.cmpi ne, %1, %c0_i32_0 : i32
    scf.if %2 {
      %c0_18 = arith.constant 0 : index
      %c0_19 = arith.constant 0 : index
      %25 = vector.load %arg2[%c0_18, %c0_19] : memref<8x128xf32, #tpu.memory_space<vmem>>, vector<8x128xf32>
      %cst_20 = arith.constant dense<0.000000e+00> : vector<8xf32>
      %26 = vector.multi_reduction <add>, %25, %cst_20 [1] : vector<8x128xf32> to vector<8xf32>
      %27 = vector.shape_cast %26 : vector<8xf32> to vector<8x1xf32>
      %cst_21 = arith.constant 3.125000e-02 : f32
      %28 = vector.broadcast %cst_21 : f32 to vector<8x1xf32>
      %29 = arith.mulf %27, %28 : vector<8x1xf32>
      %30 = arith.mulf %25, %25 : vector<8x128xf32>
      %cst_22 = arith.constant dense<0.000000e+00> : vector<8xf32>
      %31 = vector.multi_reduction <add>, %30, %cst_22 [1] : vector<8x128xf32> to vector<8xf32>
      %32 = vector.shape_cast %31 : vector<8xf32> to vector<8x1xf32>
      %cst_23 = arith.constant 3.125000e-02 : f32
      %33 = vector.broadcast %cst_23 : f32 to vector<8x1xf32>
      %34 = arith.mulf %32, %33 : vector<8x1xf32>
      %35 = arith.mulf %29, %29 : vector<8x1xf32>
      %36 = arith.subf %34, %35 : vector<8x1xf32>
      %cst_24 = arith.constant 0.000000e+00 : f32
      %37 = vector.broadcast %cst_24 : f32 to vector<8x1xf32>
      %38 = arith.maximumf %36, %37 : vector<8x1xf32>
      %39 = vector.broadcast %29 : vector<8x1xf32> to vector<8x128xf32>
      %40 = arith.subf %25, %39 : vector<8x128xf32>
      %cst_25 = arith.constant 9.99999997E-7 : f32
      %41 = vector.broadcast %cst_25 : f32 to vector<8x1xf32>
      %42 = arith.addf %38, %41 : vector<8x1xf32>
      %43 = math.rsqrt %42 : vector<8x1xf32>
      %44 = vector.broadcast %43 : vector<8x1xf32> to vector<8x128xf32>
      %45 = arith.mulf %40, %44 : vector<8x128xf32>
      %c0_26 = arith.constant 0 : index
      %c0_27 = arith.constant 0 : index
      %46 = vector.load %arg3[%c0_26, %c0_27] : memref<1x128xf32, #tpu.memory_space<vmem>>, vector<1x128xf32>
      %47 = vector.broadcast %46 : vector<1x128xf32> to vector<8x128xf32>
      %48 = arith.mulf %45, %47 : vector<8x128xf32>
      %c0_28 = arith.constant 0 : index
      %c0_29 = arith.constant 0 : index
      %49 = vector.load %arg4[%c0_28, %c0_29] : memref<1x128xf32, #tpu.memory_space<vmem>>, vector<1x128xf32>
      %50 = vector.broadcast %49 : vector<1x128xf32> to vector<8x128xf32>
      %51 = arith.addf %48, %50 : vector<8x128xf32>
      %c0_30 = arith.constant 0 : index
      %c0_31 = arith.constant 0 : index
      %52 = vector.load %arg10[%c0_30, %c0_31] : memref<8x128xf32, #tpu.memory_space<vmem>>, vector<8x128xf32>
      tpu.vector_store %arg10[%c0_30, %c0_31], %51 {strides = array<i32>} : memref<8x128xf32, #tpu.memory_space<vmem>>, vector<8x128xf32>,
      %cst_32 = arith.constant 0.000000e+00 : f32
      %53 = vector.broadcast %cst_32 : f32 to vector<8x128xf32>
      %c0_33 = arith.constant 0 : index
      %c0_34 = arith.constant 0 : index
      %54 = vector.load %arg11[%c0_33, %c0_34] : memref<8x128xf32, #tpu.memory_space<vmem>>, vector<8x128xf32>
      tpu.vector_store %arg11[%c0_33, %c0_34], %53 {strides = array<i32>} : memref<8x128xf32, #tpu.memory_space<vmem>>, vector<8x128xf32>,
    } else {
    }
    %c0 = arith.constant 0 : index
    %c0_1 = arith.constant 0 : index
    %3 = vector.load %arg10[%c0, %c0_1] : memref<8x128xf32, #tpu.memory_space<vmem>>, vector<8x128xf32>
    %c0_2 = arith.constant 0 : index
    %c0_3 = arith.constant 0 : index
    %4 = vector.load %arg5[%c0_2, %c0_3] : memref<128x128xf32, #tpu.memory_space<vmem>>, vector<128x128xf32>
    %cst = arith.constant dense<0.000000e+00> : vector<8x128xf32>
    %5 = tpu.matmul %3, %4, %cst {dimension_numbers = #tpu.dot_dimension_numbers<[1], [0], [0], [1], [0, 0, 1, 1], [], []>} : vector<8x128xf32>, vector<128x128xf32>, vector<8x128xf32> -> vector<8x128xf32>
    %c0_4 = arith.constant 0 : index
    %c0_5 = arith.constant 0 : index
    %6 = vector.load %arg6[%c0_4, %c0_5] : memref<1x128xf32, #tpu.memory_space<vmem>>, vector<1x128xf32>
    %7 = vector.broadcast %6 : vector<1x128xf32> to vector<8x128xf32>
    %8 = arith.addf %5, %7 : vector<8x128xf32>
    %cst_6 = arith.constant 5.000000e-01 : f32
    %9 = vector.broadcast %cst_6 : f32 to vector<8x128xf32>
    %10 = arith.mulf %9, %8 : vector<8x128xf32>
    %cst_7 = arith.constant 0.707106769 : f32
    %11 = vector.broadcast %cst_7 : f32 to vector<8x128xf32>
    %12 = arith.mulf %8, %11 : vector<8x128xf32>
    %13 = math.erf %12 : vector<8x128xf32>
    %cst_8 = arith.constant 1.000000e+00 : f32
    %14 = vector.broadcast %cst_8 : f32 to vector<8x128xf32>
    %15 = arith.addf %14, %13 : vector<8x128xf32>
    %16 = arith.mulf %10, %15 : vector<8x128xf32>
    %c0_9 = arith.constant 0 : index
    %c0_10 = arith.constant 0 : index
    %17 = vector.load %arg11[%c0_9, %c0_10] : memref<8x128xf32, #tpu.memory_space<vmem>>, vector<8x128xf32>
    %c0_11 = arith.constant 0 : index
    %c0_12 = arith.constant 0 : index
    %18 = vector.load %arg7[%c0_11, %c0_12] : memref<128x128xf32, #tpu.memory_space<vmem>>, vector<128x128xf32>
    %cst_13 = arith.constant dense<0.000000e+00> : vector<8x128xf32>
    %19 = tpu.matmul %16, %18, %cst_13 {dimension_numbers = #tpu.dot_dimension_numbers<[1], [0], [0], [1], [0, 0, 1, 1], [], []>} : vector<8x128xf32>, vector<128x128xf32>, vector<8x128xf32> -> vector<8x128xf32>
    %20 = arith.addf %17, %19 : vector<8x128xf32>
    %c0_14 = arith.constant 0 : index
    %c0_15 = arith.constant 0 : index
    %21 = vector.load %arg11[%c0_14, %c0_15] : memref<8x128xf32, #tpu.memory_space<vmem>>, vector<8x128xf32>
    tpu.vector_store %arg11[%c0_14, %c0_15], %20 {strides = array<i32>} : memref<8x128xf32, #tpu.memory_space<vmem>>, vector<8x128xf32>,
    %c0_i32_16 = arith.constant 0 : i32
    %22 = arith.cmpi eq, %arg1, %c0_i32_16 : i32
    %23 = arith.extui %22 : i1 to i32
    %c0_i32_17 = arith.constant 0 : i32
    %24 = arith.cmpi ne, %23, %c0_i32_17 : i32
    scf.if %24 {
      %c0_18 = arith.constant 0 : index
      %c0_19 = arith.constant 0 : index
      %25 = vector.load %arg11[%c0_18, %c0_19] : memref<8x128xf32, #tpu.memory_space<vmem>>, vector<8x128xf32>
      %c0_20 = arith.constant 0 : index
      %c0_21 = arith.constant 0 : index
      %26 = vector.load %arg8[%c0_20, %c0_21] : memref<1x128xf32, #tpu.memory_space<vmem>>, vector<1x128xf32>
      %27 = vector.broadcast %26 : vector<1x128xf32> to vector<8x128xf32>
      %28 = arith.addf %25, %27 : vector<8x128xf32>
      %c0_22 = arith.constant 0 : index
      %c0_23 = arith.constant 0 : index
      %29 = vector.load %arg2[%c0_22, %c0_23] : memref<8x128xf32, #tpu.memory_space<vmem>>, vector<8x128xf32>
      %30 = arith.addf %29, %28 : vector<8x128xf32>
      %c0_24 = arith.constant 0 : index
      %c0_25 = arith.constant 0 : index
      %31 = vector.load %arg9[%c0_24, %c0_25] : memref<8x128xf32, #tpu.memory_space<vmem>>, vector<8x128xf32>
      tpu.vector_store %arg9[%c0_24, %c0_25], %30 {strides = array<i32>} : memref<8x128xf32, #tpu.memory_space<vmem>>, vector<8x128xf32>,
    } else {
    }
    return
  }
  func.func @transform_0(%arg0: i32, %arg1: i32) -> (i32, i32) {
    %c0_i32 = arith.constant 0 : i32
    %c0_i32_0 = arith.constant 0 : i32
    return %arg0, %c0_i32 : i32, i32
  }
  func.func @transform_1(%arg0: i32, %arg1: i32) -> (i32, i32) {
    %c0_i32 = arith.constant 0 : i32
    %c0_i32_0 = arith.constant 0 : i32
    %c0_i32_1 = arith.constant 0 : i32
    return %c0_i32, %c0_i32_0 : i32, i32
  }
  func.func @transform_2(%arg0: i32, %arg1: i32) -> (i32, i32) {
    %c0_i32 = arith.constant 0 : i32
    %c0_i32_0 = arith.constant 0 : i32
    %c0_i32_1 = arith.constant 0 : i32
    return %c0_i32, %c0_i32_0 : i32, i32
  }
  func.func @transform_3(%arg0: i32, %arg1: i32) -> (i32, i32) {
    %c0_i32 = arith.constant 0 : i32
    %c0_i32_0 = arith.constant 0 : i32
    return %c0_i32, %arg1 : i32, i32
  }
  func.func @transform_4(%arg0: i32, %arg1: i32) -> (i32, i32) {
    %c0_i32 = arith.constant 0 : i32
    %c0_i32_0 = arith.constant 0 : i32
    return %c0_i32, %arg1 : i32, i32
  }
  func.func @transform_5(%arg0: i32, %arg1: i32) -> (i32, i32) {
    %c0_i32 = arith.constant 0 : i32
    %c0_i32_0 = arith.constant 0 : i32
    return %arg1, %c0_i32 : i32, i32
  }
  func.func @transform_6(%arg0: i32, %arg1: i32) -> (i32, i32) {
    %c0_i32 = arith.constant 0 : i32
    %c0_i32_0 = arith.constant 0 : i32
    %c0_i32_1 = arith.constant 0 : i32
    return %c0_i32, %c0_i32_0 : i32, i32
  }
  func.func @transform_7(%arg0: i32, %arg1: i32) -> (i32, i32) {
    %c0_i32 = arith.constant 0 : i32
    %c0_i32_0 = arith.constant 0 : i32
    return %arg0, %c0_i32 : i32, i32
  }
}

</mosaic_0001>

<bundles_post_ra>
// kernel: tpu_custom_call.1
= control target key start
LH: loop header
LB: loop body
LE: loop exit
PB: predicated region body
PF: predicated region fallthrough
CT: control target
= control target key end

     0   :  { %s1394_s0 = inlined_call_operand.hbm [shape: f32[16,128], index: 0, kind: input, shape index: {}]   ;;  %s1395_s1 = inlined_call_operand.vmem [shape: f32[1,128], index: 1, kind: input, shape index: {}]   ;;  %s1396_s2 = inlined_call_operand.vmem [shape: f32[1,128], index: 2, kind: input, shape index: {}]   ;;  %s1397_s3 = inlined_call_operand.hbm [shape: f32[128,128], index: 3, kind: input, shape index: {}]   ;;  %s1398_s4 = inlined_call_operand.vmem [shape: f32[1,128], index: 4, kind: input, shape index: {}]   ;;  %s1399_s5 = inlined_call_operand.hbm [shape: f32[128,128], index: 5, kind: input, shape index: {}]   ;;  %s1400_s6 = inlined_call_operand.vmem [shape: f32[1,128], index: 6, kind: input, shape index: {}]   ;;  %s1401_s7 = inlined_call_operand.hbm [shape: f32[16,128], index: 7, kind: output, shape index: {}]  }
   0x1   :  { %1406 = sst [smem:[#allocation15_spill]] %s1397_s3 }
   0x2   :  { %1407 = sst [smem:[#allocation16_spill]] %s1399_s5 }
   0x3   :  { %12 = vsyncpa [#allocation5], 0 }
   0x4   :  { %14 = vsyncpa [#allocation5 + $0x1], 0 }
   0x5   :  { %15 = vsyncpa [#allocation8], 0 }
   0x6   :  { %16 = vsyncpa [#allocation6], 0 }
   0x7   :  { %18 = vsyncpa [#allocation6 + $0x1], 0  ;;  %s1163_s24 = smov 0   ;;  %s1165_s25 = smov 0  }
   0x8   :  { %s1167_s26 = smov 0   ;;  %s1169_s27 = smov 0  }
   0x9   :  { %s1171_s28 = smov 0   ;;  %s1173_s29 = smov 0  }
   0xa LB: > { %s732_s30 = sadd.s32 4294967295, %s1113_s29   ;;  %s733_s8 = sadd.s32 4294967294, %s1113_s29   ;;  %s1113_s29 = sphi %s1173_s29, %s24_s29   ;;  %s1109_s28 = sphi %s1171_s28, %s1428_s28   ;;  %s1105_s27 = sphi %s1169_s27, %s1427_s27   ;;  %s1101_s26 = sphi %s1167_s26, %s1426_s26   ;;  %s1097_s25 = sphi %s1165_s25, %s1425_s25   ;;  %s1093_s24 = sphi %s1163_s24, %s1424_s24  }
   0xb   : > { %p56_p0 = scmp.ne.s32.totalorder %s1097_s25, %s1093_s24  ;;  %p1197_p1 = scmp.eq.s32.totalorder %s732_s30, 0 }
   0xc   : > { %p1201_p2 = scmp.eq.s32.totalorder %s732_s30, 1  ;;  %p227_p3 = scmp.eq.s32.totalorder %s733_s8, 1 }
   0xd   : > { %s1408_s9 = scalar_select %p1197_p1, 1, 0 }
   0xe   : > { %p1207_p4 = por %p1197_p1, %p56_p0  ;;  %p734_p5 = scmp.ge.s32.totalorder %s1113_s29, 1 }
   0xf   : > { %p1212_p6 = por %p227_p3, %p56_p0  ;;  %p234_p7 = scmp.lt.s32.totalorder %s1113_s29, 3 }
  0x10   : > { %s1410_s11 = scalar_select %p1207_p4, 1, 0 }
  0x11   : > { %s1411_s12 = scalar_select %p1212_p6, 1, 0 }
  0x12   : > { %p1217_p8 = pnand %p734_p5, %p234_p7  ;;  %s1115_s14 = smov [#allocation7]  }
  0x13   : > { %s254_s15 = sshll.u32 %s1115_s14, 4  ;;  %s1116_s17 = smov [#allocation9]   ;;  %s255_s15 = int_to_ptr.vmem [resolvable:$true] %s254_s15 }
  0x14   : > { %p870_p9 = pneg %p1217_p8  ;;  %s276_s18 = sshll.u32 %s1116_s17, 4  ;;  %s277_s18 = int_to_ptr.vmem [resolvable:$true] %s276_s18 }
  0x15   : > { %s960_s19 = scalar_lea.vmem %s255_s15, 2048  ;;  %p968_p5 = scmp.lt.s32.totalorder %s255_s15, %s255_s15 }
  0x16   : > { %p1226_p11 = pnand %p870_p9, %p1197_p1  ;;  %p961_p13 = scmp.ne.s32.totalorder %s255_s15, %s960_s19 }
  0x17   : > { %p969_p7 = scmp.lt.s32.totalorder %s960_s19, %s960_s19 }
  0x18   : > { %p951_p12 = pneg %p1226_p11 }
  0x19   : > { %p970_p10 = por %p969_p7, %p968_p5 }
  0x1a   : > { %p963_p0 = pnand %p961_p13, %p951_p12 }
  0x1c   : > { %p964_p3 = pneg %p963_p0 }
  0x1e   : > { %p971_p9 = pnand %p970_p10, %p964_p3 }
  0x20   : > { %974 = shalt.err (!%p971_p9)
}
  0x21   : > { %s1117_s20 = smov 128   ;;  %s1118_s21 = smov 8  }
  0x22   : > { %s1414_s3 = sld [smem:[#allocation15_spill]]  ;;  %s986_s30 = scalar_lea.vmem %s277_s18, 2048 }
  0x23   : > { %p987_p6 = scmp.ne.s32.totalorder %s277_s18, %s986_s30  ;;  %p994_p1 = scmp.lt.s32.totalorder %s277_s18, %s277_s18 }
  0x24   : > { %p995_p4 = scmp.lt.s32.totalorder %s986_s30, %s986_s30 }
  0x25   : > { %p989_p13 = pnand %p987_p6, %p951_p12 }
  0x26   : > { %p996_p5 = por %p995_p4, %p994_p1 }
  0x27   : > { %p990_p0 = pneg %p989_p13 }
  0x28   : > { %873 = dma.hbm_to_vmem [thread:$0]  (!%p1226_p11), %s1414_s3, 2048, %s255_s15, [#allocation8], %s1117_s20, %s1117_s20, %s1118_s21  }
  0x29   : > { %p997_p10 = pnand %p996_p5, %p990_p0 }
  0x2b   : > { %1000 = shalt.err (!%p997_p10)
}
  0x2c   : > { %s1415_s5 = sld [smem:[#allocation16_spill]]  ;;  %s36_s15 = sadd.s32 1, %s1109_s28 }
  0x2d   : > { %s43_s17 = sadd.s32 1, %s1101_s26  ;;  %p38_p1 = scmp.ge.s32.totalorder %s36_s15, 2 }
  0x2e   : > { %p50_p4 = scmp.ne.s32.totalorder %s1101_s26, %s1097_s25  ;;  %p51_p6 = scmp.eq.s32.totalorder %s1113_s29, 0 }
  0x2f   : > { %p887_p12 = scmp.lt.s32.totalorder %s1113_s29, 2  ;;  %s1430_s15 = smov (%p38_p1, %s36_s15), 0 }
  0x30   : > { %1416 = sst [smem:[#allocation14_spill]] %s1430_s15  ;;  %p52_p3 = por %p51_p6, %p50_p4 }
  0x31   : > { %p1258_p7 = por %p1201_p2, %p50_p4  ;;  %s40_s19 = ssub.s32 %s1109_s28, %s1430_s15 }
  0x32   : > { %876 = dma.hbm_to_vmem [thread:$0]  (!%p1226_p11), %s1415_s5, 2048, %s277_s18, [#allocation8], %s1117_s20, %s1117_s20, %s1118_s21  }
  0x33   : > { %s293_s22 = sand.u32 1, %s1101_s26   ;;  %p41_p9 = scmp.eq.s32.totalorder %s40_s19, 0 }
  0x34   : > { %s739_s18 = sshll.u32 %s293_s22, 3  ;;  %s740_s20 = sshll.u32 %s1109_s28, 7 }
  0x35   : > { %s1267_s21 = scalar_select %p41_p9, %s1101_s26, %s43_s17  }
  0x36   : > { %s302_s8 = scalar_lea.hbm %s1394_s0, %s740_s20  ;;  %s297_s14 = scalar_lea.vmem [#allocation4], %s739_s18 }
  0x37   : > { %s304_s3 = sshll.u32 %s297_s14, 4  ;;  %p1274_p11 = pnand %p887_p12, %p52_p3  ;;  %s305_s3 = int_to_ptr.vmem [resolvable:$true] %s304_s3 }
  0x38   : > { %s294_s5 = scalar_lea.sflag [#allocation5], %s293_s22  ;;  %s1014_s19 = scalar_lea.vmem %s305_s3, 128 }
  0x39   : > { %p1003_p2 = pneg %p1274_p11  ;;  %p1015_p13 = scmp.ne.s32.totalorder %s305_s3, %s1014_s19 }
  0x3a   : > { %s1119_s17 = smov [#allocation4]  }
  0x3b   : > { %p1017_p0 = pnand %p1015_p13, %p1003_p2  ;;  %s1019_s15 = sshll.u32 %s1119_s17, 4  ;;  %s1020_s15 = int_to_ptr.vmem [resolvable:$false] %s1019_s15 }
  0x3c   : > { %s1021_s20 = scalar_lea.vmem %s1020_s15, 256  ;;  %p1022_p10 = scmp.lt.s32.totalorder %s305_s3, %s1020_s15 }
  0x3d   : > { %p1018_p5 = pneg %p1017_p0  ;;  %p1023_p1 = scmp.lt.s32.totalorder %s1021_s20, %s1014_s19 }
  0x3f   : > { %p1024_p4 = por %p1023_p1, %p1022_p10 }
  0x41   : > { %p1025_p6 = pnand %p1024_p4, %p1018_p5 }
  0x43   : > { %1028 = shalt.err (!%p1025_p6)
}
  0x44   : > { %880 = dma.hbm_to_vmem [thread:$0]  (!%p1274_p11), %s302_s8, 128, %s305_s3, %s294_s5  }
  0x45   : > { %313 = sbr.rel (%p1217_p8) target bundleno = 674 (0x2a2), region = 48  ;;  %s1285_s22 = sand.u32 (!%p1217_p8), 1, %s1097_s25  }
  0x46   : > { %s742_s18 = sshll.u32 (!%p1217_p8), %s1285_s22, 3  ;;  %s316_s23 = scalar_lea.sflag (!%p1217_p8), [#allocation5], %s1285_s22 }
  0x47   : > { %s319_s15 = scalar_lea.vmem (!%p1217_p8), [#allocation4], %s742_s18  ;;  %p1419_p12 = scmp.ne.s32.totalorder (!%p1217_p8), %s1410_s11, 0 }
  0x4a   : > { %1080 = dma.done.wait (%p1419_p12), %s316_s23, 128  }
  0x4b   : > { %1082 = vsyncadd (%p1419_p12), %s316_s23, 4294967168  ;;  %p1420_p3 = scmp.ne.s32.totalorder %s1408_s9, 0 }
  0x4d   : > { %1084 = dma.done.wait (%p1420_p3), [#allocation8], 4096  }
  0x4e   : > { %1086 = vsyncadd (%p1420_p3), [#allocation8], 4294963200  ;;  %v1299_v0 = vld [vmem:[%s319_s15] sm:$0xff]  ;;  %v1120_v2 = vmov 0.0   ;;  %v416_v5 = vld [vmem:[#allocation7 + $0x68] sm:$0xff]  ;;  %vm1121_vm0 = vmmov 0  }
  0x4f   : > { %370 = vadd.xlane.f32.xlu0 %v1299_v0  ;;  %v373_v1 = vmul.f32 %v1299_v0, %v1299_v0  ;;  %788 = vmatprep.subr.mxu0 %v1120_v2  ;;  %v418_v3 = vld [vmem:[#allocation7 + $0x78] sm:$0xff]  ;;  %v417_v4 = vld [vmem:[#allocation7 + $0x70] sm:$0xff]  ;;  %v415_v6 = vld [vmem:[#allocation7 + $0x60] sm:$0xff]  ;;  %s751_s10 = sshll.u32 %s1105_s27, 7  ;;  %s360_s19 = scalar_lea.vmem [#allocation10], %s742_s18 }
  0x50   : > { %823 = vmatprep.subr.mxu1 %v1120_v2  ;;  %789 = vmatpush3.msra.mxu0 %v418_v3  ;;  %v414_v7 = vld [vmem:[#allocation7 + $0x58] sm:$0xff]  ;;  %v413_v8 = vld [vmem:[#allocation7 + $0x50] sm:$0xff]  ;;  %v412_v9 = vld [vmem:[#allocation7 + $0x48] sm:$0xff]  ;;  %s619_s17 = sshll.u32 %s360_s19, 4  ;;  %s617_s15 = scalar_lea.hbm %s1401_s7, %s751_s10  ;;  %s620_s17 = int_to_ptr.vmem [resolvable:$true] %s619_s17 }
  0x51   : > { %790 = vmatprep.subr.mxu0 %v1120_v2  ;;  %v411_v10 = vld [vmem:[#allocation7 + $0x40] sm:$0xff]  ;;  %820 = vmatprep.mubr.msk.f32.mxu0 %vm1121_vm0, %v1120_v2  ;;  %v410_v11 = vld [vmem:[#allocation7 + $0x38] sm:$0xff]  ;;  %v409_v12 = vld [vmem:[#allocation7 + $0x30] sm:$0xff]  ;;  %s606_s3 = scalar_lea.sflag [#allocation6], %s1285_s22  ;;  %s1029_s5 = scalar_lea.vmem %s620_s17, 128 }
  0x52   : > { %791 = vmatpush3.msra.mxu0 %v417_v4  ;;  %855 = vmatprep.mubr.msk.f32.mxu1 %vm1121_vm0, %v1120_v2  ;;  %v408_v13 = vld [vmem:[#allocation7 + $0x28] sm:$0xff]  ;;  %v407_v14 = vld [vmem:[#allocation7 + $0x20] sm:$0xff]  ;;  %v406_v15 = vld [vmem:[#allocation7 + $0x18] sm:$0xff]  ;;  %p1030_p8 = scmp.ne.s32.totalorder %s620_s17, %s1029_s5  ;;  %s1122_s27 = smov [#allocation10]  }
  0x53   : > { %374 = vadd.xlane.f32.xlu0 %v373_v1  ;;  %792 = vmatprep.subr.mxu0 %v1120_v2  ;;  %v405_v16 = vld [vmem:[#allocation7 + $0x10] sm:$0xff]  ;;  %v404_v17 = vld [vmem:[#allocation7 + $0x8] sm:$0xff]  ;;  %v403_v18 = vld [vmem:[#allocation7] sm:$0xff]  ;;  %s1033_s9 = sshll.u32 %s1122_s27, 4  ;;  %s1034_s9 = int_to_ptr.vmem [resolvable:$false] %s1033_s9 }
  0x54   : > { %793 = vmatpush3.msra.mxu0 %v416_v5  ;;  %v517_v19 = vld [vmem:[#allocation9 + $0x78] sm:$0xff]  ;;  %v516_v20 = vld [vmem:[#allocation9 + $0x70] sm:$0xff]  ;;  %v515_v21 = vld [vmem:[#allocation9 + $0x68] sm:$0xff]  ;;  %p1031_p9 = pnand %p1030_p8, %p1258_p7  ;;  %s1035_s18 = scalar_lea.vmem %s1034_s9, 256 }
  0x55   : > { %794 = vmatprep.subr.mxu0 %v1120_v2  ;;  %824 = vmatpush3.msra.mxu1 %v517_v19  ;;  %v514_v22 = vld [vmem:[#allocation9 + $0x60] sm:$0xff]  ;;  %v746_v33 = vld [vmem:[%s1395_s1] ss:$0 sm:$0xff]  ;;  %v513_v38 = vld [vmem:[#allocation9 + $0x58] sm:$0xff]  ;;  %p1036_p2 = scmp.lt.s32.totalorder %s620_s17, %s1034_s9  ;;  %p1037_p13 = scmp.lt.s32.totalorder %s1035_s18, %s1029_s5 }
  0x56   : > { %795 = vmatpush3.msra.mxu0 %v415_v6  ;;  %825 = vmatprep.subr.mxu1 %v1120_v2  ;;  %v747_v35 = vld [vmem:[%s1396_s2] ss:$0 sm:$0xff]  ;;  %v511_v40 = vld [vmem:[#allocation9 + $0x48] sm:$0xff]  ;;  %v510_v41 = vld [vmem:[#allocation9 + $0x40] sm:$0xff]  ;;  %p1032_p11 = pneg %p1031_p9 }
  0x57   : > { %796 = vmatprep.subr.mxu0 %v1120_v2  ;;  %826 = vmatpush3.msra.mxu1 %v516_v20  ;;  %v512_v39 = vld [vmem:[#allocation9 + $0x50] sm:$0xff]  ;;  %v509_v42 = vld [vmem:[#allocation9 + $0x38] sm:$0xff]  ;;  %v507_v44 = vld [vmem:[#allocation9 + $0x28] sm:$0xff]  ;;  %p1038_p0 = por %p1037_p13, %p1036_p2 }
  0x58   : > { %797 = vmatpush3.msra.mxu0 %v414_v7  ;;  %827 = vmatprep.subr.mxu1 %v1120_v2  ;;  %v508_v43 = vld [vmem:[#allocation9 + $0x30] sm:$0xff]  ;;  %v506_v45 = vld [vmem:[#allocation9 + $0x20] sm:$0xff]  ;;  %v505_v46 = vld [vmem:[#allocation9 + $0x18] sm:$0xff] }
  0x59   : > { %798 = vmatprep.subr.mxu0 %v1120_v2  ;;  %828 = vmatpush3.msra.mxu1 %v515_v21  ;;  %v504_v47 = vld [vmem:[#allocation9 + $0x10] sm:$0xff]  ;;  %v503_v48 = vld [vmem:[#allocation9 + $0x8] sm:$0xff]  ;;  %v502_v49 = vld [vmem:[#allocation9] sm:$0xff]  ;;  %p1039_p5 = pnand %p1038_p0, %p1032_p11 }
  0x5a   : > { %799 = vmatpush3.msra.mxu0 %v413_v8  ;;  %829 = vmatprep.subr.mxu1 %v1120_v2  ;;  %v748_v50 = vld [vmem:[%s1398_s4] ss:$0 sm:$0xff] }
  0x5b   : > { %800 = vmatprep.subr.mxu0 %v1120_v2  ;;  %830 = vmatpush3.msra.mxu1 %v514_v22  ;;  %v749_v59 = vld [vmem:[%s1400_s6] ss:$0 sm:$0xff] }
  0x5c   : > { %801 = vmatpush3.msra.mxu0 %v412_v9  ;;  %831 = vmatprep.subr.mxu1 %v1120_v2 }
  0x5d   : > { %802 = vmatprep.subr.mxu0 %v1120_v2  ;;  %832 = vmatpush3.msra.mxu1 %v513_v38 }
  0x5e   : > { %803 = vmatpush3.msra.mxu0 %v411_v10  ;;  %833 = vmatprep.subr.mxu1 %v1120_v2 }
  0x5f   : > { %804 = vmatprep.subr.mxu0 %v1120_v2  ;;  %834 = vmatpush3.msra.mxu1 %v512_v39 }
  0x60   : > { %805 = vmatpush3.msra.mxu0 %v410_v11  ;;  %835 = vmatprep.subr.mxu1 %v1120_v2 }
  0x61   : > { %806 = vmatprep.subr.mxu0 %v1120_v2  ;;  %836 = vmatpush3.msra.mxu1 %v511_v40 }
  0x62   : > { %807 = vmatpush3.msra.mxu0 %v409_v12  ;;  %837 = vmatprep.subr.mxu1 %v1120_v2 }
  0x63   : > { %808 = vmatprep.subr.mxu0 %v1120_v2  ;;  %838 = vmatpush3.msra.mxu1 %v510_v41 }
  0x64   : > { %809 = vmatpush3.msra.mxu0 %v408_v13  ;;  %839 = vmatprep.subr.mxu1 %v1120_v2 }
  0x65   : > { %810 = vmatprep.subr.mxu0 %v1120_v2  ;;  %840 = vmatpush3.msra.mxu1 %v509_v42 }
  0x66   : > { %811 = vmatpush3.msra.mxu0 %v407_v14  ;;  %841 = vmatprep.subr.mxu1 %v1120_v2 }
  0x67   : > { %812 = vmatprep.subr.mxu0 %v1120_v2  ;;  %842 = vmatpush3.msra.mxu1 %v508_v43 }
  0x68   : > { %813 = vmatpush3.msra.mxu0 %v406_v15  ;;  %843 = vmatprep.subr.mxu1 %v1120_v2 }
  0x69   : > { %814 = vmatprep.subr.mxu0 %v1120_v2  ;;  %844 = vmatpush3.msra.mxu1 %v507_v44 }
  0x6a   : > { %815 = vmatpush3.msra.mxu0 %v405_v16  ;;  %845 = vmatprep.subr.mxu1 %v1120_v2 }
  0x6b   : > { %816 = vmatprep.subr.mxu0 %v1120_v2  ;;  %846 = vmatpush3.msra.mxu1 %v506_v45 }
  0x6c   : > { %817 = vmatpush3.msra.mxu0 %v404_v17  ;;  %847 = vmatprep.subr.mxu1 %v1120_v2 }
  0x6d   : > { %818 = vmatprep.subr.mxu0 %v1120_v2  ;;  %848 = vmatpush3.msra.mxu1 %v505_v46 }
  0x6e   : > { %819 = vmatpush3.msra.mxu0 %v403_v18  ;;  %849 = vmatprep.subr.mxu1 %v1120_v2 }
  0x6f   : > { %850 = vmatpush3.msra.mxu1 %v504_v47 }
  0x70   : > { %851 = vmatprep.subr.mxu1 %v1120_v2 }
  0x71   : > { %852 = vmatpush3.msra.mxu1 %v503_v48 }
  0x72   : > { %853 = vmatprep.subr.mxu1 %v1120_v2 }
  0x73   : > { %854 = vmatpush3.msra.mxu1 %v502_v49 }
  0xd8   : > { %v371_v23 = vpop.xlane.xlu0 %370 }
  0xd9   : > { %v372_v24 = vmul.f32 0.03125, %v371_v23 }
  0xdb   : > { %v377_v26 = vmul.f32 %v372_v24, %v372_v24  ;;  %v380_v31 = vsub.f32 %v1299_v0, %v372_v24 }
  0xdc   : > { %v375_v25 = vpop.xlane.xlu0 %374 }
  0xdd   : > { %v376_v27 = vmul.f32 0.03125, %v375_v25 }
  0xdf   : > { %v378_v28 = vsub.f32 %v376_v27, %v377_v26 }
  0xe1   : > { %v379_v29 = vmax.f32 %v378_v28, 0.0 }
  0xe3   : > { %v381_v30 = vadd.f32 1e-06, %v379_v29 }
  0xe5   : > { %945 = vrsqrt.f32 %v381_v30 }
  0xf2   : > { %v946_v32 = vpop.eup %945 }
  0xf3   : > { %v383_v34 = vmul.f32 %v946_v32, %v380_v31 }
  0xf5   : > { %v391_v36 = vmul.f32 %v746_v33, %v383_v34 }
  0xf7   : > { %v399_v37 = vadd.f32 %v747_v35, %v391_v36 }
  0xf9   : > { %821 = vmatmul.mubr.f32.vlgmr.msra.gmra.mxu0 %v399_v37 }
 0x1b9   : > { %v492_v51 = vpop.f32.mrf.mxu0 }
 0x1ba   : > { %v493_v52 = vadd.f32 %v748_v50, %v492_v51 }
 0x1bb   : > { %v822_v53 = vpop.f32.mrf.mxu0 }
 0x1bc   : > { %v497_v54 = vmul.f32 0.70710677, %v493_v52  ;;  %v496_v56 = vmul.f32 0.5, %v493_v52 }
 0x1be   : > { %947 = verf.f32 %v497_v54 }
 0x1cb   : > { %v948_v55 = vpop.eup %947 }
 0x1cc   : > { %v499_v57 = vadd.f32 1.0, %v948_v55 }
 0x1ce   : > { %v500_v58 = vmul.f32 %v499_v57, %v496_v56 }
 0x1d0   : > { %856 = vmatmul.mubr.f32.vlgmr.msra.gmra.mxu1 %v500_v58 }
 0x290   : > { %v584_v60 = vpop.f32.mrf.mxu1 }
 0x291   : > { %v601_v61 = vadd.f32 %v749_v59, %v584_v60 }
 0x292   : > { %v857_v62 = vpop.f32.mrf.mxu1 }
 0x293   : > { %v603_v63 = vadd.f32 %v601_v61, %v1299_v0 }
 0x295   : > { %604 = vst [vmem:[%s360_s19] sm:$0xff] %v603_v63 }
 0x296   : > { %1042 = shalt.err (!%p1039_p5)
}
 0x297   : > { %s1043_s11 = scalar_lea.hbm %s617_s15, 128  ;;  %s1047_s30 = scalar_lea.hbm %s1401_s7, 256 }
 0x298   : > { %p1044_p10 = scmp.ne.s32.totalorder %s617_s15, %s1043_s11  ;;  %p1048_p6 = scmp.lt.s32.totalorder %s617_s15, %s1401_s7 }
 0x299   : > { %p1049_p12 = scmp.lt.s32.totalorder %s1047_s30, %s1043_s11 }
 0x29a   : > { %p1045_p1 = pnand %p1044_p10, %p1258_p7 }
 0x29b   : > { %p1050_p3 = por %p1049_p12, %p1048_p6 }
 0x29c   : > { %p1046_p4 = pneg %p1045_p1 }
 0x29e   : > { %p1051_p8 = pnand %p1050_p3, %p1046_p4 }
 0x2a0   : > { %1054 = shalt.err (!%p1051_p8)
}
 0x2a1   : > { %868 = dma.vmem_to_hbm [thread:$0]  (%p1258_p7), %s620_s17, 128, %s617_s15, %s606_s3  }
 0x2a2 PF: > { %s631_s10 = sand.u32 1, %s1093_s24   ;;  %p1421_p9 = scmp.ne.s32.totalorder %s1411_s12, 0 }
 0x2a3   : > { %p1422_p11 = scmp.ge.s32.totalorder %s1113_s29, 2  ;;  %s632_s19 = scalar_lea.sflag [#allocation6], %s631_s10 }
 0x2a5   : > { %p882_p2 = pnand %p1422_p11, %p1421_p9 }
 0x2a7   : > { %p883_p13 = pneg %p882_p2 }
 0x2a9   : > { %1088 = dma.done.wait (%p883_p13), %s632_s19, 128  }
 0x2aa   : > { %1090 = vsyncadd (%p883_p13), %s632_s19, 4294967168  ;;  %s24_s29 = sadd.s32 1, %s1113_s29   ;;  %s1423_s16 = sld [smem:[#allocation14_spill]] }
 0x2ab   : > { %p21_p0 = scmp.ge.s32.totalorder %s24_s29, 4   ;;  %s1424_s24 = smov %s1097_s25 }
 0x2ac   : > { %s1425_s25 = smov %s1101_s26  ;;  %s1426_s26 = smov %s1267_s21 }
 0x2ad   : > { %s1427_s27 = smov %s1109_s28  ;;  %23 = sbr.rel (!%p21_p0) target bundleno = 10 (0xa), region = 114 }
 0x2b0   : > { %s1428_s28 = smov %s1423_s16 }
 0x2b2   :  { %637 = vsyncpa [#allocation5], 1 }
 0x2b3   :  { %639 = vsyncpa [#allocation5 + $0x1], 1 }
 0x2b4   :  { %640 = vsyncpa [#allocation8], 1 }
 0x2b5   :  { %641 = vsyncpa [#allocation6], 1 }
 0x2b6   :  { %643 = vsyncpa [#allocation6 + $0x1], 1 }

</bundles_post_ra>
